<compile_context>
chip_gen: v7x
topology: tpu7x:2x2x1
jax: 0.10.0
libtpu: 0.0.40
codegen_flags: <defaults>
</compile_context>

<pallas_src>
import functools

import jax
import jax.numpy as jnp
from jax.experimental import pallas as pl
from jax.experimental.pallas import tpu as pltpu

LANE = 128
SUBLANE = 8
SMOOTH = 1.0
_VMEM_LIMIT = 32 * 1024 * 1024


def _round_up(x, m):
    return ((x + m - 1) // m) * m


def _num_tensorcores():
    """Best-effort TensorCores per chip (2 on v7x-class parts, else 1)."""
    try:
        kind = jax.devices()[0].device_kind.lower()
    except Exception:
        return 1
    return 2 if "v7" in kind else 1


def _row_fold(x):
    """(R, L) -> (8, L): sum groups of 8 consecutive rows.

    Slices are sublane-tile aligned -> free views; adds are plain VPU vreg adds.
    """
    r, _ = x.shape
    acc = x[:SUBLANE]
    for g in range(1, r // SUBLANE):
        acc = acc + x[g * SUBLANE:(g + 1) * SUBLANE]
    return acc


def _lane_fold(x, width):
    """(C, T) -> (C, width): sum lane-tiles of `width` columns.

    Slices are lane-tile aligned -> free views; adds are plain VPU vreg adds.
    """
    _, t = x.shape
    if t <= width:
        return x
    acc = x[:, :width]
    for k in range(1, t // width):
        acc = acc + x[:, k * width:(k + 1) * width]
    return acc


# ----------------------------------------------------------------------------
# Binary (num_classes == 1) branch
# ----------------------------------------------------------------------------
def _binary_iou_kernel(pred_ref, tgt_ref, inter_ref, union_ref, *,
                       inner, rows, needs_mask):
    c = pl.program_id(0)
    i = pl.program_id(1)

    @pl.when(i == 0)
    def _():
        inter_ref[...] = jnp.zeros_like(inter_ref)
        union_ref[...] = jnp.zeros_like(union_ref)

    # sigmoid(x) >= 0.5  <=>  x >= 0  (sigmoid is monotone): no EUP sigmoid.
    p = (pred_ref[...] >= 0).astype(jnp.float32)        # (tr, L)
    t = tgt_ref[...].astype(jnp.float32)                # (tr, L)
    tr, L = p.shape

    def acc(pp, tt):
        # Fold (tr, L) -> (8, L) in registers, then one accumulator RMW/step.
        inter_ref[...] += _row_fold(pp * tt)
        union_ref[...] += _row_fold(pp + tt)

    if needs_mask:
        blk = c * inner + i
        full_blocks = rows // tr
        is_clean = blk < full_blocks

        @pl.when(is_clean)
        def _():
            acc(p, t)

        @pl.when(jnp.logical_not(is_clean))
        def _():
            # Ragged last block (and clamped overflow blocks): zero the rows
            # past the valid range so undefined VMEM contents cannot leak.
            rid = jax.lax.broadcasted_iota(jnp.int32, (tr, L), 0)
            valid = rows - blk * tr
            m = (rid < valid).astype(jnp.float32)
            acc(p * m, t * m)
    else:
        acc(p, t)


def iou2d_binary(pred, target, smooth=SMOOTH, *, tile_rows=4096, n_split=None):
    if n_split is None:
        n_split = _num_tensorcores()

    p = pred.reshape(-1)
    t = target.reshape(-1)                   # keep native dtype; cast in-kernel
    if not jnp.issubdtype(p.dtype, jnp.floating):
        p = p.astype(jnp.float32)
    n = p.shape[0]

    # Pick a lane width giving a free (no-copy) 2-D reshape.
    if n % LANE == 0:
        L = LANE
    else:
        last = pred.shape[-1] if pred.ndim > 1 else 1
        if last > 1 and n % last == 0:
            L = last                          # natural trailing dim always divides n
        else:
            # Degenerate 1-D input: tiny pad to a lane multiple.
            pad = _round_up(n, LANE) - n
            p = jnp.pad(p, (0, pad), constant_values=-1.0)
            t = jnp.pad(t, (0, pad), constant_values=0)
            n += pad
            L = LANE
    rows = n // L
    p2 = p.reshape(rows, L)
    t2 = t.reshape(rows, L)

    if rows < SUBLANE:
        # Sub-vreg input: pad a handful of rows so the block row dim (a
        # multiple of 8) never exceeds the array.  Padded logits are negative
        # (-> 0 after threshold), padded targets are 0: no contribution.
        p2 = jnp.pad(p2, ((0, SUBLANE - rows), (0, 0)), constant_values=-1.0)
        t2 = jnp.pad(t2, ((0, SUBLANE - rows), (0, 0)), constant_values=0)
        rows = SUBLANE

    tr = min(_round_up(tile_rows, SUBLANE), (rows // SUBLANE) * SUBLANE)
    blocks = pl.cdiv(rows, tr)
    n_split = max(1, min(n_split, blocks))
    inner = pl.cdiv(blocks, n_split)
    needs_mask = (n_split * inner * tr) != rows
    max_blk = blocks - 1

    acc_sds = jax.ShapeDtypeStruct((n_split, SUBLANE, L), jnp.float32)
    acc_spec = pl.BlockSpec((None, SUBLANE, L), lambda c, i: (c, 0, 0))
    # Clamp overflow block indices into range; their contribution is masked
    # to zero in-kernel, so the (tiny) duplicate read is harmless.
    in_spec = pl.BlockSpec(
        (tr, L), lambda c, i: (jnp.minimum(c * inner + i, max_blk), 0))

    inter, union = pl.pallas_call(
        functools.partial(_binary_iou_kernel, inner=inner, rows=rows,
                          needs_mask=needs_mask),
        out_shape=(acc_sds, acc_sds),
        grid_spec=pltpu.PrefetchScalarGridSpec(
            num_scalar_prefetch=0,
            grid=(n_split, inner),
            in_specs=[in_spec, in_spec],
            out_specs=(acc_spec, acc_spec)),
        compiler_params=pltpu.CompilerParams(
            dimension_semantics=("parallel", "arbitrary"),
            vmem_limit_bytes=_VMEM_LIMIT),
    )(p2, t2)

    i_sum = jnp.sum(inter)
    den = jnp.sum(union) - i_sum
    return (i_sum + smooth) / (den + smooth)


# ----------------------------------------------------------------------------
# Multiclass branch (classes on sublanes, spatial on lanes — no transpose/pad)
# ----------------------------------------------------------------------------
def _multiclass_iou_kernel(pred_ref, tgt_ref, inter_ref, union_ref, *,
                           inner, hw, needs_mask, int_labels):
    s = pl.program_id(1)
    j = pl.program_id(2)

    @pl.when(j == 0)
    def _():
        inter_ref[...] = jnp.zeros_like(inter_ref)
        union_ref[...] = jnp.zeros_like(union_ref)

    x = pred_ref[...]                        # (C, T) logits; classes = sublanes
    C, T = x.shape
    cls = jax.lax.broadcasted_iota(jnp.int32, (C, T), 0)

    # argmax(softmax(x), class) == argmax(x, class); pick the first maximum.
    xmax = jnp.max(x, axis=0, keepdims=True)
    amax = jnp.min(jnp.where(x == xmax, cls, C), axis=0, keepdims=True)
    pred_oh = (cls == amax).astype(jnp.float32)

    t = tgt_ref[...]                         # (1, T) labels, native dtype
    if int_labels:
        tgt_oh = (cls == t.astype(jnp.int32)).astype(jnp.float32)
    else:
        # float labels keep the original float-equality semantics
        tgt_oh = (cls.astype(jnp.float32) == t.astype(jnp.float32)).astype(jnp.float32)

    w = inter_ref.shape[-1]

    def acc(po, to):
        # Fold (C, T) -> (C, w<=128) in registers; one accumulator RMW/step.
        inter_ref[...] += _lane_fold(po * to, w)
        union_ref[...] += _lane_fold(po + to, w)

    if needs_mask:
        blk = s * inner + j
        full_blocks = hw // T
        is_clean = blk < full_blocks

        @pl.when(is_clean)
        def _():
            acc(pred_oh, tgt_oh)

        @pl.when(jnp.logical_not(is_clean))
        def _():
            # Mask BOTH one-hots past the valid spatial extent (undefined VMEM
            # in the ragged tail / clamped overflow blocks must not leak).
            pos = jax.lax.broadcasted_iota(jnp.int32, (1, T), 1) + blk * T
            m = (pos < hw).astype(jnp.float32)
            acc(pred_oh * m, tgt_oh * m)
    else:
        acc(pred_oh, tgt_oh)


def iou2d_multiclass(pred, target, num_classes, smooth=SMOOTH, *,
                     tile_hw=None, s_split=None):
    B, C, H, W = pred.shape
    hw = H * W
    x = pred.reshape(B, C, hw)               # free reshape, stays NCHW order
    t = target.reshape(B, 1, hw)             # keep native dtype; handled in-kernel
    int_labels = jnp.issubdtype(t.dtype, jnp.integer) or t.dtype == jnp.bool_

    if hw <= LANE:
        tile_hw = hw                          # single full-width block
    else:
        if tile_hw is None:
            # ~1 MiB of logits per grid step, lane aligned.
            tile_hw = max(LANE, ((1 << 20) // (4 * C)) // LANE * LANE)
        # never let a block exceed the array's spatial extent
        tile_hw = max(LANE, min((tile_hw // LANE) * LANE, (hw // LANE) * LANE))

    blocks = pl.cdiv(hw, tile_hw)
    if s_split is None:
        # Spatial split only buys anything with 2 TensorCores and an
        # odd/small batch; otherwise the batch axis already parallelizes.
        s_split = _num_tensorcores() if (B % 2) else 1
    s_split = max(1, min(s_split, blocks))
    inner = pl.cdiv(blocks, s_split)
    needs_mask = (s_split * inner * tile_hw) != hw
    max_blk = blocks - 1
    acc_l = min(tile_hw, LANE)

    acc_sds = jax.ShapeDtypeStruct((B, s_split, C, acc_l), jnp.float32)
    acc_spec = pl.BlockSpec((None, None, C, acc_l), lambda b, s, j: (b, s, 0, 0))
    pred_spec = pl.BlockSpec(
        (None, C, tile_hw),
        lambda b, s, j: (b, 0, jnp.minimum(s * inner + j, max_blk)))
    tgt_spec = pl.BlockSpec(
        (None, 1, tile_hw),
        lambda b, s, j: (b, 0, jnp.minimum(s * inner + j, max_blk)))

    inter, union = pl.pallas_call(
        functools.partial(_multiclass_iou_kernel, inner=inner, hw=hw,
                          needs_mask=needs_mask, int_labels=int_labels),
        out_shape=(acc_sds, acc_sds),
        grid_spec=pltpu.PrefetchScalarGridSpec(
            num_scalar_prefetch=0,
            grid=(B, s_split, inner),
            in_specs=[pred_spec, tgt_spec],
            out_specs=(acc_spec, acc_spec)),
        compiler_params=pltpu.CompilerParams(
            dimension_semantics=("parallel", "parallel", "arbitrary"),
            vmem_limit_bytes=_VMEM_LIMIT),
    )(x, t)

    inter_c = jnp.sum(inter, axis=(0, 1, 3))
    union_c = jnp.sum(union, axis=(0, 1, 3))
    den = union_c - inter_c
    return jnp.mean((inter_c + smooth) / (den + smooth))


# ----------------------------------------------------------------------------
# Module-like wrapper (IoU2D has no learnable parameters)
# ----------------------------------------------------------------------------
class IoU2D:
    def __init__(self, num_classes=1):
        self.num_classes = num_classes
        self.smooth = SMOOTH

    def __call__(self, pred, target):
        if self.num_classes == 1:
            return iou2d_binary(pred, target, self.smooth)
        return iou2d_multiclass(pred, target, self.num_classes, self.smooth)


if __name__ == "__main__":
    key = jax.random.PRNGKey(0)
    k1, k2, k3, k4 = jax.random.split(key, 4)

    # ---- binary branch (module default: num_classes=1) ----
    B, H, W = 2, 16, 16
    pred = jax.random.normal(k1, (B, 1, H, W), jnp.float32)
    target = (jax.random.uniform(k2, (B, 1, H, W)) > 0.5).astype(jnp.float32)

    def binary_ref(p, t):
        pr = (jax.nn.sigmoid(p) >= 0.5).astype(jnp.float32).reshape(-1)
        tr_ = t.reshape(-1)
        inter = jnp.sum(pr * tr_)
        den = jnp.sum(pr) + jnp.sum(tr_) - inter
        return (inter + SMOOTH) / (den + SMOOTH)

    metric = IoU2D(num_classes=1)
    iou = jax.block_until_ready(metric(pred, target))
    ref = binary_ref(pred, target)
    assert jnp.allclose(iou, ref, rtol=1e-5, atol=1e-5), (iou, ref)

    # binary with a ragged spatial size (exercises in-kernel tail masking)
    pred_r = jax.random.normal(k1, (2, 1, 10, 10), jnp.float32)
    target_r = (jax.random.uniform(k2, (2, 1, 10, 10)) > 0.5).astype(jnp.float32)
    iou_r = jax.block_until_ready(metric(pred_r, target_r))
    ref_r = binary_ref(pred_r, target_r)
    assert jnp.allclose(iou_r, ref_r, rtol=1e-5, atol=1e-5), (iou_r, ref_r)

    # ---- multiclass branch ----
    C = 4

    def multiclass_ref(p, t):
        am = jnp.argmax(p, axis=1)
        tm = t.reshape(t.shape[0], -1).reshape(am.shape)
        ious = []
        for c in range(C):
            pc = (am == c).astype(jnp.float32)
            tc = (tm == c).astype(jnp.float32)
            i_ = jnp.sum(pc * tc)
            d_ = jnp.sum(pc) + jnp.sum(tc) - i_
            ious.append((i_ + SMOOTH) / (d_ + SMOOTH))
        return jnp.mean(jnp.stack(ious))

    pred_mc = jax.random.normal(k3, (B, C, H, W), jnp.float32)
    target_mc = jax.random.randint(k4, (B, 1, H, W), 0, C).astype(jnp.float32)

    metric_mc = IoU2D(num_classes=C)
    iou_mc = jax.block_until_ready(metric_mc(pred_mc, target_mc))
    ref_mc = multiclass_ref(pred_mc, target_mc)
    assert jnp.allclose(iou_mc, ref_mc, rtol=1e-5, atol=1e-5), (iou_mc, ref_mc)

    # integer-dtype labels (exercises the int compare path, no HBM float cast)
    iou_mc_i = jax.block_until_ready(metric_mc(pred_mc, target_mc.astype(jnp.int32)))
    assert jnp.allclose(iou_mc_i, ref_mc, rtol=1e-5, atol=1e-5), (iou_mc_i, ref_mc)

    # multiclass with a ragged spatial size (exercises in-kernel tail masking)
    pred_mcr = jax.random.normal(k3, (B, C, 13, 13), jnp.float32)
    target_mcr = jax.random.randint(k4, (B, 1, 13, 13), 0, C).astype(jnp.float32)
    iou_mcr = jax.block_until_ready(metric_mc(pred_mcr, target_mcr))
    ref_mcr = multiclass_ref(pred_mcr, target_mcr)
    assert jnp.allclose(iou_mcr, ref_mcr, rtol=1e-5, atol=1e-5), (iou_mcr, ref_mcr)

    print("KERNEL_OK")
</pallas_src>

<mosaic_0001>
module attributes {stable_mosaic.version = 11 : i64} {
  func.func @_binary_iou_kernel(%arg0: i32, %arg1: i32, %arg2: memref<8x128xf32, #tpu.memory_space<vmem>>, %arg3: memref<8x128xf32, #tpu.memory_space<vmem>>, %arg4: memref<1x8x128xf32, #tpu.memory_space<vmem>>, %arg5: memref<1x8x128xf32, #tpu.memory_space<vmem>>) attributes {dimension_semantics = [#tpu.dimension_semantics<parallel>, #tpu.dimension_semantics<arbitrary>], iteration_bounds = array<i64: 1, 1>, scalar_prefetch = 0 : i64, scratch_operands = 0 : i64, tpu.core_type = #tpu.core_type<tc>, window_params = [{transform_indices = @transform_0, window_bounds = array<i64: 8, 128>}, {transform_indices = @transform_1, window_bounds = array<i64: 8, 128>}, {transform_indices = @transform_2, window_bounds = array<i64: 1, 8, 128>}, {transform_indices = @transform_3, window_bounds = array<i64: 1, 8, 128>}]} {
    %c0_i32 = arith.constant 0 : i32
    %0 = arith.cmpi eq, %arg1, %c0_i32 : i32
    %1 = arith.extui %0 : i1 to i32
    %c0_i32_0 = arith.constant 0 : i32
    %2 = arith.cmpi ne, %1, %c0_i32_0 : i32
    scf.if %2 {
      %cst_16 = arith.constant 0.000000e+00 : f32
      %23 = vector.broadcast %cst_16 : f32 to vector<8x128xf32>
      %c0_17 = arith.constant 0 : index
      %c0_18 = arith.constant 0 : index
      %c0_19 = arith.constant 0 : index
      %24 = vector.load %arg4[%c0_17, %c0_18, %c0_19] : memref<1x8x128xf32, #tpu.memory_space<vmem>>, vector<1x8x128xf32>
      %25 = vector.shape_cast %24 : vector<1x8x128xf32> to vector<8x128xf32>
      %26 = vector.shape_cast %23 : vector<8x128xf32> to vector<1x8x128xf32>
      tpu.vector_store %arg4[%c0_17, %c0_18, %c0_19], %26 {strides = array<i32>} : memref<1x8x128xf32, #tpu.memory_space<vmem>>, vector<1x8x128xf32>,
      %cst_20 = arith.constant 0.000000e+00 : f32
      %27 = vector.broadcast %cst_20 : f32 to vector<8x128xf32>
      %c0_21 = arith.constant 0 : index
      %c0_22 = arith.constant 0 : index
      %c0_23 = arith.constant 0 : index
      %28 = vector.load %arg5[%c0_21, %c0_22, %c0_23] : memref<1x8x128xf32, #tpu.memory_space<vmem>>, vector<1x8x128xf32>
      %29 = vector.shape_cast %28 : vector<1x8x128xf32> to vector<8x128xf32>
      %30 = vector.shape_cast %27 : vector<8x128xf32> to vector<1x8x128xf32>
      tpu.vector_store %arg5[%c0_21, %c0_22, %c0_23], %30 {strides = array<i32>} : memref<1x8x128xf32, #tpu.memory_space<vmem>>, vector<1x8x128xf32>,
    } else {
    }
    %c0 = arith.constant 0 : index
    %c0_1 = arith.constant 0 : index
    %3 = vector.load %arg2[%c0, %c0_1] : memref<8x128xf32, #tpu.memory_space<vmem>>, vector<8x128xf32>
    %cst = arith.constant 0.000000e+00 : f32
    %4 = vector.broadcast %cst : f32 to vector<8x128xf32>
    %5 = arith.cmpf oge, %3, %4 : vector<8x128xf32>
    %6 = arith.extui %5 : vector<8x128xi1> to vector<8x128xi32>
    %7 = arith.sitofp %6 : vector<8x128xi32> to vector<8x128xf32>
    %c0_2 = arith.constant 0 : index
    %c0_3 = arith.constant 0 : index
    %8 = vector.load %arg3[%c0_2, %c0_3] : memref<8x128xf32, #tpu.memory_space<vmem>>, vector<8x128xf32>
    %c0_4 = arith.constant 0 : index
    %c0_5 = arith.constant 0 : index
    %c0_6 = arith.constant 0 : index
    %9 = vector.load %arg4[%c0_4, %c0_5, %c0_6] : memref<1x8x128xf32, #tpu.memory_space<vmem>>, vector<1x8x128xf32>
    %10 = vector.shape_cast %9 : vector<1x8x128xf32> to vector<8x128xf32>
    %11 = arith.mulf %7, %8 : vector<8x128xf32>
    %12 = arith.addf %10, %11 : vector<8x128xf32>
    %c0_7 = arith.constant 0 : index
    %c0_8 = arith.constant 0 : index
    %c0_9 = arith.constant 0 : index
    %13 = vector.load %arg4[%c0_7, %c0_8, %c0_9] : memref<1x8x128xf32, #tpu.memory_space<vmem>>, vector<1x8x128xf32>
    %14 = vector.shape_cast %13 : vector<1x8x128xf32> to vector<8x128xf32>
    %15 = vector.shape_cast %12 : vector<8x128xf32> to vector<1x8x128xf32>
    tpu.vector_store %arg4[%c0_7, %c0_8, %c0_9], %15 {strides = array<i32>} : memref<1x8x128xf32, #tpu.memory_space<vmem>>, vector<1x8x128xf32>,
    %c0_10 = arith.constant 0 : index
    %c0_11 = arith.constant 0 : index
    %c0_12 = arith.constant 0 : index
    %16 = vector.load %arg5[%c0_10, %c0_11, %c0_12] : memref<1x8x128xf32, #tpu.memory_space<vmem>>, vector<1x8x128xf32>
    %17 = vector.shape_cast %16 : vector<1x8x128xf32> to vector<8x128xf32>
    %18 = arith.addf %7, %8 : vector<8x128xf32>
    %19 = arith.addf %17, %18 : vector<8x128xf32>
    %c0_13 = arith.constant 0 : index
    %c0_14 = arith.constant 0 : index
    %c0_15 = arith.constant 0 : index
    %20 = vector.load %arg5[%c0_13, %c0_14, %c0_15] : memref<1x8x128xf32, #tpu.memory_space<vmem>>, vector<1x8x128xf32>
    %21 = vector.shape_cast %20 : vector<1x8x128xf32> to vector<8x128xf32>
    %22 = vector.shape_cast %19 : vector<8x128xf32> to vector<1x8x128xf32>
    tpu.vector_store %arg5[%c0_13, %c0_14, %c0_15], %22 {strides = array<i32>} : memref<1x8x128xf32, #tpu.memory_space<vmem>>, vector<1x8x128xf32>,
    return
  }
  func.func @transform_0(%arg0: i32, %arg1: i32) -> (i32, i32) {
    %c1_i32 = arith.constant 1 : i32
    %0 = arith.muli %arg0, %c1_i32 : i32
    %1 = arith.addi %0, %arg1 : i32
    %c0_i32 = arith.constant 0 : i32
    %2 = arith.minsi %1, %c0_i32 : i32
    %c0_i32_0 = arith.constant 0 : i32
    %c0_i32_1 = arith.constant 0 : i32
    return %2, %c0_i32_0 : i32, i32
  }
  func.func @transform_1(%arg0: i32, %arg1: i32) -> (i32, i32) {
    %c1_i32 = arith.constant 1 : i32
    %0 = arith.muli %arg0, %c1_i32 : i32
    %1 = arith.addi %0, %arg1 : i32
    %c0_i32 = arith.constant 0 : i32
    %2 = arith.minsi %1, %c0_i32 : i32
    %c0_i32_0 = arith.constant 0 : i32
    %c0_i32_1 = arith.constant 0 : i32
    return %2, %c0_i32_0 : i32, i32
  }
  func.func @transform_2(%arg0: i32, %arg1: i32) -> (i32, i32, i32) {
    %c0_i32 = arith.constant 0 : i32
    %c0_i32_0 = arith.constant 0 : i32
    %c0_i32_1 = arith.constant 0 : i32
    return %arg0, %c0_i32, %c0_i32_0 : i32, i32, i32
  }
  func.func @transform_3(%arg0: i32, %arg1: i32) -> (i32, i32, i32) {
    %c0_i32 = arith.constant 0 : i32
    %c0_i32_0 = arith.constant 0 : i32
    %c0_i32_1 = arith.constant 0 : i32
    return %arg0, %c0_i32, %c0_i32_0 : i32, i32, i32
  }
}

</mosaic_0001>

<bundles_post_ra>
// kernel: tpu_custom_call.1
= control target key start
LH: loop header
LB: loop body
LE: loop exit
PB: predicated region body
PF: predicated region fallthrough
CT: control target
= control target key end

     0   :  { %9 = vsyncpa [#allocation3], 0  ;;  %s283_s0 = inlined_call_operand.hbm [shape: f32[8,128], index: 0, kind: input, shape index: {}]   ;;  %s284_s1 = inlined_call_operand.hbm [shape: f32[8,128], index: 1, kind: input, shape index: {}]   ;;  %s285_s2 = inlined_call_operand.hbm [shape: f32[1,8,128], index: 2, kind: output, shape index: {0}]   ;;  %s286_s3 = inlined_call_operand.hbm [shape: f32[1,8,128], index: 3, kind: output, shape index: {1}]  }
   0x1   :  { %10 = vsyncpa [#allocation6], 0 }
   0x2   :  { %11 = vsyncpa [#allocation4], 0 }
   0x3   :  { %12 = vsyncpa [#allocation9], 0  ;;  %s210_s12 = smov [#allocation2]   ;;  %s211_s14 = smov [#allocation5]  }
   0x4   :  { %s24_s13 = sshll.u32 %s210_s12, 4  ;;  %s39_s15 = sshll.u32 %s211_s14, 4  ;;  %s25_s13 = int_to_ptr.vmem [resolvable:$true] %s24_s13  ;;  %s40_s15 = int_to_ptr.vmem [resolvable:$true] %s39_s15 }
   0x5   :  { %s114_s18 = scalar_lea.hbm %s283_s0, 128 }
   0x6   :  { %p115_p0 = scmp.ne.s32.totalorder %s283_s0, %s114_s18  ;;  %p118_p1 = scmp.lt.u32.totalorder %s114_s18, %s283_s0 }
   0x8   :  { %p120_p2 = pnand %p118_p1, %p115_p0 }
   0xa   :  { %123 = shalt.err (!%p120_p2)
}
   0xb   :  { %s124_s23 = scalar_lea.vmem %s25_s13, 128  ;;  %p129_p4 = scmp.lt.s32.totalorder %s25_s13, %s25_s13 }
   0xc   :  { %p125_p3 = scmp.ne.s32.totalorder %s25_s13, %s124_s23  ;;  %p130_p5 = scmp.lt.s32.totalorder %s124_s23, %s124_s23 }
   0xe   :  { %p131_p6 = por %p130_p5, %p129_p4 }
  0x10   :  { %p132_p7 = pnand %p131_p6, %p125_p3 }
  0x12   :  { %135 = shalt.err (!%p132_p7)
}
  0x13   :  { %27 = dma.hbm_to_vmem [thread:$0]  %s283_s0, 128, %s25_s13, [#allocation3]  }
  0x14   :  { %s136_s28 = scalar_lea.hbm %s284_s1, 128 }
  0x15   :  { %p137_p8 = scmp.ne.s32.totalorder %s284_s1, %s136_s28  ;;  %p140_p9 = scmp.lt.u32.totalorder %s136_s28, %s284_s1 }
  0x17   :  { %p142_p10 = pnand %p140_p9, %p137_p8 }
  0x19   :  { %145 = shalt.err (!%p142_p10)
}
  0x1a   :  { %s146_s6 = scalar_lea.vmem %s40_s15, 128  ;;  %p151_p12 = scmp.lt.s32.totalorder %s40_s15, %s40_s15 }
  0x1b   :  { %p147_p11 = scmp.ne.s32.totalorder %s40_s15, %s146_s6  ;;  %p152_p13 = scmp.lt.s32.totalorder %s146_s6, %s146_s6 }
  0x1d   :  { %p153_p0 = por %p152_p13, %p151_p12 }
  0x1f   :  { %p154_p1 = pnand %p153_p0, %p147_p11 }
  0x21   :  { %157 = shalt.err (!%p154_p1)
}
  0x22   :  { %42 = dma.hbm_to_vmem [thread:$0]  %s284_s1, 128, %s40_s15, [#allocation6]  }
  0x23   :  { %202 = dma.done.wait [#allocation3], 128  }
  0x24   :  { %203 = vsyncadd [#allocation3], 4294967168 }
  0x25   :  { %204 = dma.done.wait [#allocation6], 128  }
  0x26   :  { %205 = vsyncadd [#allocation6], 4294967168  ;;  %v61_v0 = vld [vmem:[#allocation2] sm:$0xff]  ;;  %v65_v1 = vld [vmem:[#allocation5] sm:$0xff]  ;;  %v212_v2 = vmov 0.0   ;;  %s213_s8 = smov [#allocation7]  }
  0x27   :  { %vm62_vm0 = vcmp.ge.f32.partialorder %v61_v0, 0.0  ;;  %s80_s9 = sshll.u32 %s213_s8, 4  ;;  %s214_s10 = smov [#allocation8]   ;;  %s81_s9 = int_to_ptr.vmem [resolvable:$true] %s80_s9 }
  0x28   :  { %v108_v3 = vsel %vm62_vm0, 1.0, %v212_v2  ;;  %s90_s11 = sshll.u32 %s214_s10, 4  ;;  %s158_s1 = scalar_lea.vmem %s81_s9, 128  ;;  %s91_s11 = int_to_ptr.vmem [resolvable:$true] %s90_s11 }
  0x29   :  { %v67_v4 = vmul.f32 %v108_v3, %v65_v1  ;;  %v71_v5 = vadd.f32 %v108_v3, %v65_v1  ;;  %p159_p2 = scmp.ne.s32.totalorder %s81_s9, %s158_s1  ;;  %p163_p3 = scmp.lt.s32.totalorder %s81_s9, %s81_s9 }
  0x2a   :  { %p164_p4 = scmp.lt.s32.totalorder %s158_s1, %s158_s1 }
  0x2b   :  { %69 = vst [vmem:[#allocation7] sm:$0xff] %v67_v4  ;;  %73 = vst [vmem:[#allocation8] sm:$0xff] %v71_v5 }
  0x2c   :  { %p165_p5 = por %p164_p4, %p163_p3 }
  0x2e   :  { %p166_p6 = pnand %p165_p5, %p159_p2 }
  0x30   :  { %169 = shalt.err (!%p166_p6)
}
  0x31   :  { %s170_s14 = scalar_lea.hbm %s285_s2, 128 }
  0x32   :  { %p171_p7 = scmp.ne.s32.totalorder %s285_s2, %s170_s14  ;;  %p174_p8 = scmp.lt.u32.totalorder %s170_s14, %s285_s2 }
  0x34   :  { %p176_p9 = pnand %p174_p8, %p171_p7 }
  0x36   :  { %179 = shalt.err (!%p176_p9)
}
  0x37   :  { %83 = dma.vmem_to_hbm [thread:$0]  %s81_s9, 128, %s285_s2, [#allocation4]  }
  0x38   :  { %s180_s21 = scalar_lea.vmem %s91_s11, 128  ;;  %p185_p11 = scmp.lt.s32.totalorder %s91_s11, %s91_s11 }
  0x39   :  { %p181_p10 = scmp.ne.s32.totalorder %s91_s11, %s180_s21  ;;  %p186_p12 = scmp.lt.s32.totalorder %s180_s21, %s180_s21 }
  0x3b   :  { %p187_p13 = por %p186_p12, %p185_p11 }
  0x3d   :  { %p188_p0 = pnand %p187_p13, %p181_p10 }
  0x3f   :  { %191 = shalt.err (!%p188_p0)
}
  0x40   :  { %s192_s24 = scalar_lea.hbm %s286_s3, 128 }
  0x41   :  { %p193_p1 = scmp.ne.s32.totalorder %s286_s3, %s192_s24  ;;  %p196_p2 = scmp.lt.u32.totalorder %s192_s24, %s286_s3 }
  0x43   :  { %p198_p3 = pnand %p196_p2, %p193_p1 }
  0x45   :  { %201 = shalt.err (!%p198_p3)
}
  0x46   :  { %93 = dma.vmem_to_hbm [thread:$0]  %s91_s11, 128, %s286_s3, [#allocation9]  }
  0x47   :  { %206 = dma.done.wait [#allocation4], 128  }
  0x48   :  { %207 = vsyncadd [#allocation4], 4294967168 }
  0x49   :  { %208 = dma.done.wait [#allocation9], 128  }
  0x4a   :  { %209 = vsyncadd [#allocation9], 4294967168 }
  0x4b   :  { %100 = vsyncpa [#allocation3], 1 }
  0x4c   :  { %101 = vsyncpa [#allocation6], 1 }
  0x4d   :  { %102 = vsyncpa [#allocation4], 1 }
  0x4e   :  { %103 = vsyncpa [#allocation9], 1 }

</bundles_post_ra>
